<compile_context>
chip_gen: v5e
topology: v5e:2x2
jax: 0.10.0
libtpu: 0.0.40
codegen_flags: <defaults>
</compile_context>

<pallas_src>
import jax
import jax.numpy as jnp
from jax.experimental import pallas as pl
from jax.experimental.pallas import tpu as pltpu


def _attention_kernel(w_ref, b_ref, x_ref, o_ref):
    # w_ref: (C,) f32 in SMEM       b_ref: (1,) f32 in SMEM
    # x_ref: (Bt, C, HW) f32 VMEM   o_ref: (Bt, 1, HW) f32 VMEM
    _, C, hw = x_ref.shape

    # 1x1 conv == per-channel scalar weighted sum over channels (VPU only,
    # statically unrolled over the small channel count).
    acc = w_ref[0] * x_ref[:, 0, :]                        # (Bt, HW)
    for c in range(1, C):
        acc = acc + w_ref[c] * x_ref[:, c, :]
    mask = jax.nn.sigmoid(acc + b_ref[0])                  # (Bt, HW), > 0

    # 2 * L1 norm per batch element (sigmoid > 0, so no abs needed).
    norm = 2.0 * jnp.sum(mask, axis=-1, keepdims=True)     # (Bt, 1)
    scale = float(hw) / norm                               # (Bt, 1) divides only
    o_ref[:, 0, :] = mask * scale                          # lane-dense store


def _pick_block_batch(B, C, HW, budget_bytes=8 << 20):
    """Largest divisor of B whose double-buffered in+out block fits the budget.

    Budget is kept well under the smallest scoped-VMEM default (16 MiB on v5e)
    and the v7x 32 MiB default, accounting for sublane padding of C.
    """
    c_pad = -(-C // 8) * 8
    per_batch = (c_pad * HW * 4 + 8 * HW * 4) * 2   # input + output, x2 buffers
    max_bt = max(1, budget_bytes // per_batch)
    bt = 1
    for d in range(1, B + 1):
        if B % d == 0 and d <= max_bt:
            bt = d
    return bt


def attention_block(x_nchw, w, b):
    """x_nchw: (B, C, H, W); w: (C, 1) conv weight; b: () bias -> (B, 1, H, W)."""
    B, C, H, W = x_nchw.shape
    HW = H * W

    # NCHW -> (B, C, HW): contiguous reshape, no transpose / extra HBM pass.
    x = x_nchw.reshape(B, C, HW).astype(jnp.float32)
    w_flat = jnp.reshape(w, (C,)).astype(jnp.float32)
    b_flat = jnp.reshape(b, (1,)).astype(jnp.float32)

    Bt = _pick_block_batch(B, C, HW)
    grid = (B // Bt,)

    out = pl.pallas_call(
        _attention_kernel,
        out_shape=jax.ShapeDtypeStruct((B, 1, HW), jnp.float32),
        grid_spec=pltpu.PrefetchScalarGridSpec(
            num_scalar_prefetch=0,
            grid=grid,
            in_specs=[
                # two scalars' worth of parameters -> SMEM (no VMEM tile waste)
                pl.BlockSpec(memory_space=pltpu.MemorySpace.SMEM),   # w (C,)
                pl.BlockSpec(memory_space=pltpu.MemorySpace.SMEM),   # b (1,)
                pl.BlockSpec((Bt, C, HW), lambda bi: (bi, 0, 0)),    # x block
            ],
            out_specs=pl.BlockSpec((Bt, 1, HW), lambda bi: (bi, 0, 0)),
        ),
        compiler_params=pltpu.CompilerParams(
            dimension_semantics=("parallel",)),
    )(w_flat, b_flat, x)

    # (B, 1, HW) -> (B, 1, H, W): free reshape, matches PyTorch NCHW output.
    return out.reshape(B, 1, H, W)


def attention_block_ref(x_nchw, w, b):
    """Pure-JAX reference for correctness checking."""
    B, C, H, W = x_nchw.shape
    logits = jnp.einsum("bchw,c->bhw", x_nchw, jnp.reshape(w, (C,))) + b
    mask = jax.nn.sigmoid(logits)[:, None, :, :]                  # (B,1,H,W)
    norm = 2.0 * jnp.sum(jnp.abs(mask), axis=(1, 2, 3), keepdims=True)
    return mask * H * W / norm


if __name__ == "__main__":
    key = jax.random.PRNGKey(0)
    k_x, k_w, k_b = jax.random.split(key, 3)

    B, C, H, W = 2, 4, 16, 16
    x = jax.random.normal(k_x, (B, C, H, W), dtype=jnp.float32)
    # Deterministic Conv2d(C -> 1, k=1) parameters (synthetic init)
    w = jax.random.normal(k_w, (C, 1), dtype=jnp.float32) * 0.1
    b = jax.random.normal(k_b, (), dtype=jnp.float32) * 0.1

    out = attention_block(x, w, b)
    out = jax.block_until_ready(out)

    ref = attention_block_ref(x, w, b)
    assert out.shape == (B, 1, H, W), out.shape
    assert jnp.allclose(out, ref, atol=1e-5, rtol=1e-5), (
        float(jnp.max(jnp.abs(out - ref))))

    print("KERNEL_OK")
</pallas_src>

<mosaic_0001>
module attributes {stable_mosaic.version = 11 : i64} {
  func.func @_attention_kernel(%arg0: i32, %arg1: memref<4xf32, #tpu.memory_space<smem>>, %arg2: memref<1xf32, #tpu.memory_space<smem>>, %arg3: memref<2x4x256xf32, #tpu.memory_space<vmem>>, %arg4: memref<2x1x256xf32, #tpu.memory_space<vmem>>) attributes {dimension_semantics = [#tpu.dimension_semantics<parallel>], iteration_bounds = array<i64: 1>, scalar_prefetch = 0 : i64, scratch_operands = 0 : i64, tpu.core_type = #tpu.core_type<tc>, window_params = [{transform_indices = @transform_0, window_bounds = array<i64: 4>}, {transform_indices = @transform_1, window_bounds = array<i64: 1>}, {transform_indices = @transform_2, window_bounds = array<i64: 2, 4, 256>}, {transform_indices = @transform_3, window_bounds = array<i64: 2, 1, 256>}]} {
    %c0 = arith.constant 0 : index
    %0 = memref.load %arg1[%c0] : memref<4xf32, #tpu.memory_space<smem>>
    %c0_0 = arith.constant 0 : index
    %c0_1 = arith.constant 0 : index
    %c0_2 = arith.constant 0 : index
    %1 = vector.load %arg3[%c0_0, %c0_1, %c0_2] : memref<2x4x256xf32, #tpu.memory_space<vmem>>, vector<2x1x256xf32>
    %2 = vector.shape_cast %1 : vector<2x1x256xf32> to vector<2x256xf32>
    %3 = vector.broadcast %0 : f32 to vector<2x256xf32>
    %4 = arith.mulf %3, %2 : vector<2x256xf32>
    %c1 = arith.constant 1 : index
    %5 = memref.load %arg1[%c1] : memref<4xf32, #tpu.memory_space<smem>>
    %c0_3 = arith.constant 0 : index
    %c1_4 = arith.constant 1 : index
    %c0_5 = arith.constant 0 : index
    %6 = vector.load %arg3[%c0_3, %c1_4, %c0_5] : memref<2x4x256xf32, #tpu.memory_space<vmem>>, vector<2x1x256xf32>
    %7 = vector.shape_cast %6 : vector<2x1x256xf32> to vector<2x256xf32>
    %8 = vector.broadcast %5 : f32 to vector<2x256xf32>
    %9 = arith.mulf %8, %7 : vector<2x256xf32>
    %10 = arith.addf %4, %9 : vector<2x256xf32>
    %c2 = arith.constant 2 : index
    %11 = memref.load %arg1[%c2] : memref<4xf32, #tpu.memory_space<smem>>
    %c0_6 = arith.constant 0 : index
    %c2_7 = arith.constant 2 : index
    %c0_8 = arith.constant 0 : index
    %12 = vector.load %arg3[%c0_6, %c2_7, %c0_8] : memref<2x4x256xf32, #tpu.memory_space<vmem>>, vector<2x1x256xf32>
    %13 = vector.shape_cast %12 : vector<2x1x256xf32> to vector<2x256xf32>
    %14 = vector.broadcast %11 : f32 to vector<2x256xf32>
    %15 = arith.mulf %14, %13 : vector<2x256xf32>
    %16 = arith.addf %10, %15 : vector<2x256xf32>
    %c3 = arith.constant 3 : index
    %17 = memref.load %arg1[%c3] : memref<4xf32, #tpu.memory_space<smem>>
    %c0_9 = arith.constant 0 : index
    %c3_10 = arith.constant 3 : index
    %c0_11 = arith.constant 0 : index
    %18 = vector.load %arg3[%c0_9, %c3_10, %c0_11] : memref<2x4x256xf32, #tpu.memory_space<vmem>>, vector<2x1x256xf32>
    %19 = vector.shape_cast %18 : vector<2x1x256xf32> to vector<2x256xf32>
    %20 = vector.broadcast %17 : f32 to vector<2x256xf32>
    %21 = arith.mulf %20, %19 : vector<2x256xf32>
    %22 = arith.addf %16, %21 : vector<2x256xf32>
    %c0_12 = arith.constant 0 : index
    %23 = memref.load %arg2[%c0_12] : memref<1xf32, #tpu.memory_space<smem>>
    %24 = vector.broadcast %23 : f32 to vector<2x256xf32>
    %25 = arith.addf %22, %24 : vector<2x256xf32>
    %26 = arith.negf %25 : vector<2x256xf32>
    %27 = math.exp %26 : vector<2x256xf32>
    %cst = arith.constant 1.000000e+00 : f32
    %28 = vector.broadcast %cst : f32 to vector<2x256xf32>
    %29 = arith.addf %28, %27 : vector<2x256xf32>
    %30 = arith.divf %28, %29 : vector<2x256xf32>
    %cst_13 = arith.constant dense<0.000000e+00> : vector<2xf32>
    %31 = vector.multi_reduction <add>, %30, %cst_13 [1] : vector<2x256xf32> to vector<2xf32>
    %32 = vector.shape_cast %31 : vector<2xf32> to vector<2x1xf32>
    %cst_14 = arith.constant 2.000000e+00 : f32
    %33 = vector.broadcast %cst_14 : f32 to vector<2x1xf32>
    %34 = arith.mulf %33, %32 : vector<2x1xf32>
    %cst_15 = arith.constant 2.560000e+02 : f32
    %35 = vector.broadcast %cst_15 : f32 to vector<2x1xf32>
    %36 = arith.divf %35, %34 : vector<2x1xf32>
    %37 = vector.broadcast %36 : vector<2x1xf32> to vector<2x256xf32>
    %38 = arith.mulf %30, %37 : vector<2x256xf32>
    %c0_16 = arith.constant 0 : index
    %c0_17 = arith.constant 0 : index
    %c0_18 = arith.constant 0 : index
    %39 = vector.load %arg4[%c0_16, %c0_17, %c0_18] : memref<2x1x256xf32, #tpu.memory_space<vmem>>, vector<2x1x256xf32>
    %40 = vector.shape_cast %39 : vector<2x1x256xf32> to vector<2x256xf32>
    %41 = vector.shape_cast %38 : vector<2x256xf32> to vector<2x1x256xf32>
    tpu.vector_store %arg4[%c0_16, %c0_17, %c0_18], %41 {strides = array<i32>} : memref<2x1x256xf32, #tpu.memory_space<vmem>>, vector<2x1x256xf32>,
    return
  }
  func.func @transform_0(%arg0: i32) -> i32 {
    %c0_i32 = arith.constant 0 : i32
    %c0_i32_0 = arith.constant 0 : i32
    return %c0_i32 : i32
  }
  func.func @transform_1(%arg0: i32) -> i32 {
    %c0_i32 = arith.constant 0 : i32
    %c0_i32_0 = arith.constant 0 : i32
    return %c0_i32 : i32
  }
  func.func @transform_2(%arg0: i32) -> (i32, i32, i32) {
    %c0_i32 = arith.constant 0 : i32
    %c0_i32_0 = arith.constant 0 : i32
    %c0_i32_1 = arith.constant 0 : i32
    return %arg0, %c0_i32, %c0_i32_0 : i32, i32, i32
  }
  func.func @transform_3(%arg0: i32) -> (i32, i32, i32) {
    %c0_i32 = arith.constant 0 : i32
    %c0_i32_0 = arith.constant 0 : i32
    %c0_i32_1 = arith.constant 0 : i32
    return %arg0, %c0_i32, %c0_i32_0 : i32, i32, i32
  }
}

</mosaic_0001>

<bundles_post_ra>
// kernel: tpu_custom_call.1
= control target key start
LH: loop header
LB: loop body
LE: loop exit
PB: predicated region body
PF: predicated region fallthrough
CT: control target
= control target key end

     0   :  { %9 = vsyncpa [#allocation6], 0  ;;  %s315_s0 = inlined_call_operand.vmem [shape: f32[4], index: 0, kind: input, shape index: {}]   ;;  %s316_s1 = inlined_call_operand.<no memory space> [shape: f32[1], index: 1, kind: input, shape index: {}]   ;;  %s317_s2 = inlined_call_operand.hbm [shape: f32[2,4,256], index: 2, kind: input, shape index: {}]   ;;  %s318_s3 = inlined_call_operand.hbm [shape: f32[2,1,256], index: 3, kind: output, shape index: {}]  }
   0x1   :  { %10 = vsyncpa [#allocation4], 0 }
   0x2   :  { %11 = vsyncpa [#allocation5], 0  ;;  %s17_s14 = sshll.u32 %s315_s0, 4  ;;  %s27_s17 = sshll.u32 %s317_s2, 4  ;;  %s18_s14 = int_to_ptr.vmem [resolvable:$true] %s17_s14  ;;  %s28_s17 = int_to_ptr.hbm [resolvable:$true] %s27_s17 }
   0x3   :  { %s276_s18 = smov [#allocation3]   ;;  %s277_s19 = smov [#allocation7]  }
   0x4   :  { %20 = dma.vmem_to_smem %s18_s14, 16, %s276_s18, [#allocation6]  }
   0x5   :  { %s29_s20 = sshll.u32 %s277_s19, 4  ;;  %s278_s21 = smov 128   ;;  %s30_s20 = int_to_ptr.vmem [resolvable:$true] %s29_s20 }
   0x6   :  { %s279_s22 = smov 8  }
   0x7   :  { %35 = dma.hbm_to_vmem [thread:$0]  %s28_s17, 256, %s30_s20, [#allocation4], %s278_s21, %s278_s21, %s279_s22  }
   0x8   :  { %270 = dma.done.wait [#allocation6], 16  }
   0x9   :  { %271 = vsyncadd [#allocation6], 4294967280 }
   0xa   :  { %272 = dma.done.wait [#allocation4], 256  }
   0xb   :  { %273 = vsyncadd [#allocation4], 4294967040 }
   0xc   :  { %44 = sfence }
   0xd   :  { %s45_s0 = sld [smem:[#allocation3]]  ;;  %v46_v0 = vld [vmem:[#allocation7] ss:$4 sm:$0x3]  ;;  %v83_v24 = vstv %s316_s1  ;;  %vm133_vm8 = vcmask 1041408   ;;  %s280_s1 = smov [#allocation8]  }
   0xe   :  { %s188_s23 = sld [smem:[#allocation3 + $0x1]]  ;;  %v48_v1 = vld [vmem:[#allocation7 + $0x8] ss:$4 sm:$0x3]  ;;  %s172_s27 = sshll.u32 %s280_s1, 4  ;;  %s173_s27 = int_to_ptr.vmem [resolvable:$true] %s172_s27 }
   0xf   :  { %s189_s24 = sld [smem:[#allocation3 + $0x2]]  ;;  %v54_v2 = vld [vmem:[#allocation7 + $0x1] ss:$4 sm:$0x3]  ;;  %s174_s30 = sshll.u32 %s318_s3, 4  ;;  %s175_s30 = int_to_ptr.hbm [resolvable:$true] %s174_s30 }
  0x10   :  { %s190_s2 = sld [smem:[#allocation3 + $0x3]]  ;;  %v56_v3 = vld [vmem:[#allocation7 + $0x9] ss:$4 sm:$0x3]  ;;  %s281_s4 = smov 32  }
  0x11   :  { %v64_v8 = vld [vmem:[#allocation7 + $0x2] ss:$4 sm:$0x3]  ;;  %v66_v9 = vld [vmem:[#allocation7 + $0xa] ss:$4 sm:$0x3] }
  0x12   :  { %v74_v13 = vld [vmem:[#allocation7 + $0x3] ss:$4 sm:$0x3]  ;;  %v76_v14 = vld [vmem:[#allocation7 + $0xb] ss:$4 sm:$0x3] }
  0x13   :  { %v49_v4 = vstv %s45_s0  ;;  %s282_s5 = smov 2  }
  0x14   :  { %v50_v5 = vmul.f32 %v49_v4, %v46_v0  ;;  %v51_v6 = vmul.f32 %v49_v4, %v48_v1  ;;  %v57_v7 = vstv %s188_s23 }
  0x15   :  { %v58_v10 = vmul.f32 %v57_v7, %v54_v2  ;;  %v59_v11 = vmul.f32 %v57_v7, %v56_v3  ;;  %v67_v12 = vstv %s189_s24 }
  0x16   :  { %v68_v17 = vmul.f32 %v67_v12, %v64_v8  ;;  %v69_v18 = vmul.f32 %v67_v12, %v66_v9  ;;  %v77_v19 = vstv %s190_s2  ;;  %v162_v8 = vlaneseq }
  0x17   :  { %v60_v15 = vadd.f32 %v58_v10, %v50_v5  ;;  %v61_v16 = vadd.f32 %v59_v11, %v51_v6  ;;  %v78_v22 = vmul.f32 %v77_v19, %v74_v13  ;;  %v79_v23 = vmul.f32 %v77_v19, %v76_v14 }
  0x18   :  { %vm164_vm13 = vcmp.lt.s32.totalorder %v162_v8, 256 }
  0x19   :  { %v70_v20 = vadd.f32 %v68_v17, %v60_v15  ;;  %v71_v21 = vadd.f32 %v69_v18, %v61_v16 }
  0x1b   :  { %v80_v25 = vadd.f32 %v78_v22, %v70_v20  ;;  %v81_v26 = vadd.f32 %v79_v23, %v71_v21 }
  0x1d   :  { %v84_v27 = vadd.f32 %v83_v24, %v80_v25  ;;  %v85_v28 = vadd.f32 %v83_v24, %v81_v26 }
  0x1f   :  { %v191_v29 = vmul.f32 -1.442695, %v84_v27  ;;  %v192_v30 = vmul.f32 -1.442695, %v85_v28 }
  0x21   :  { %200 = vpow2.f32 %v191_v29 }
  0x22   :  { %202 = vpow2.f32 %v192_v30 }
  0x27   :  { %v201_v31 = vpop.eup %200 }
  0x28   :  { %v203_v32 = vpop.eup %202  ;;  %v92_v33 = vadd.f32 1.0, %v201_v31 }
  0x29   :  { %v93_v34 = vadd.f32 1.0, %v203_v32 }
  0x2a   :  { %204 = vrcp.f32 %v92_v33  ;;  %vm99_vm0 = vweird.f32 %v92_v33  ;;  %v105_v38 = vand.u32 2147483648, %v92_v33  ;;  %v103_v41 = vand.u32 2147483647, %v92_v33 }
  0x2b   :  { %206 = vrcp.f32 %v93_v34  ;;  %v120_v42 = vand.u32 2147483648, %v93_v34  ;;  %vm114_vm2 = vweird.f32 %v93_v34  ;;  %v118_v44 = vand.u32 2147483647, %v93_v34 }
  0x2c   :  { %v106_v46 = vor.u32 1.1754944e-38, %v105_v38  ;;  %vm104_vm5 = vcmp.eq.f32.partialorder %v103_v41, 8.507059e+37 }
  0x2d   :  { %v121_v49 = vor.u32 1.1754944e-38, %v120_v42  ;;  %vm119_vm7 = vcmp.eq.f32.partialorder %v118_v44, 8.507059e+37 }
  0x30   :  { %v205_v35 = vpop.eup %204 }
  0x31   :  { %v207_v36 = vpop.eup %206  ;;  %v95_v37 = vmul.f32 %v205_v35, %v92_v33  ;;  %vm100_vm1 = vweird.f32 %v205_v35 }
  0x32   :  { %v110_v39 = vmul.f32 %v207_v36, %v93_v34  ;;  %vm115_vm3 = vweird.f32 %v207_v36  ;;  %vm101_vm4 = vmor %vm99_vm0, %vm100_vm1 }
  0x33   :  { %v96_v40 = vsub.f32 1.0, %v95_v37  ;;  %vm116_vm6 = vmor %vm114_vm2, %vm115_vm3 }
  0x34   :  { %v111_v43 = vsub.f32 1.0, %v110_v39 }
  0x35   :  { %v97_v45 = vmul.f32 %v205_v35, %v96_v40 }
  0x36   :  { %v112_v47 = vmul.f32 %v207_v36, %v111_v43 }
  0x37   :  { %v98_v48 = vadd.f32 %v205_v35, %v97_v45 }
  0x38   :  { %v113_v50 = vadd.f32 %v207_v36, %v112_v47 }
  0x39   :  { %v102_v51 = vsel %vm101_vm4, %v205_v35, %v98_v48 }
  0x3a   :  { %v107_v52 = vsel %vm104_vm5, %v106_v46, %v102_v51  ;;  %v117_v53 = vsel %vm116_vm6, %v207_v36, %v113_v50 }
  0x3b   :  { %v122_v54 = vsel %vm119_vm7, %v121_v49, %v117_v53  ;;  %126 = vst [vmem:[#allocation1] ss:$9 sm:$0xff] %v107_v52 }
  0x3c   :  { %128 = vst [vmem:[#allocation1 + $0x1] ss:$9 sm:$0xff] %v122_v54 }
  0x43   :  { %v129_v55 = vld [vmem:[#allocation1] sm:$0xff]  ;;  %v130_v56 = vld [vmem:[#allocation1 + $0x9] sm:$0xff] }
  0x44   :  { %v134_v57 = vsel %vm133_vm8, %v129_v55, 0.0  ;;  %v135_v58 = vsel %vm133_vm8, %v130_v56, 0.0 }
  0x45   :  { %v136_v59 = vadd.f32 %v135_v58, %v134_v57 }
  0x47   :  { %137 = vadd.xlane.f32.xlu0 %v136_v59 }
  0xba   :  { %v138_v60 = vpop.xlane.xlu0 %137 }
  0xbb   :  { %v139_v61 = vmul.f32 2.0, %v138_v60 }
  0xbd   :  { %208 = vrcp.f32 %v139_v61  ;;  %v151_v1 = vand.u32 2147483648, %v139_v61  ;;  %v149_v3 = vand.u32 2147483647, %v139_v61  ;;  %vm145_vm10 = vweird.f32 %v139_v61 }
  0xbf   :  { %v152_v5 = vor.u32 1.1754944e-38, %v151_v1  ;;  %vm150_vm12 = vcmp.eq.f32.partialorder %v149_v3, 8.507059e+37 }
  0xc3   :  { %v209_v62 = vpop.eup %208 }
  0xc4   :  { %v141_v63 = vmul.f32 %v209_v62, %v139_v61  ;;  %vm146_vm9 = vweird.f32 %v209_v62 }
  0xc5   :  { %vm147_vm11 = vmor %vm145_vm10, %vm146_vm9 }
  0xc6   :  { %v142_v0 = vsub.f32 1.0, %v141_v63 }
  0xc8   :  { %v143_v2 = vmul.f32 %v209_v62, %v142_v0 }
  0xca   :  { %v144_v4 = vadd.f32 %v209_v62, %v143_v2 }
  0xcc   :  { %v148_v6 = vsel %vm147_vm11, %v209_v62, %v144_v4 }
  0xcd   :  { %v153_v7 = vsel %vm150_vm12, %v152_v5, %v148_v6 }
  0xce   :  { %v154_v9 = vmul.f32 256.0, %v153_v7 }
  0xd0   :  { %v156_v10 = vperm.slane %v154_v9, 0  ;;  %v157_v11 = vperm.slane %v154_v9, 1 }
  0xd2   :  { %v160_v12 = vmul.f32 %v156_v10, %v107_v52  ;;  %v161_v13 = vmul.f32 %v157_v11, %v122_v54 }
  0xd4   :  { %166 = vst.msk [vmem:[#allocation8] sm:$0x3] %vm164_vm13, %v160_v12 }
  0xd5   :  { %167 = vst.msk [vmem:[#allocation8 + $0x2] sm:$0x3] %vm164_vm13, %v161_v13 }
  0xd6   :  { %180 = dma.vmem_to_hbm [thread:$0]  %s173_s27, 64, %s175_s30, [#allocation5], %s281_s4, %s281_s4, %s282_s5  }
  0xd7   :  { %274 = dma.done.wait [#allocation5], 64  }
  0xd8   :  { %275 = vsyncadd [#allocation5], 4294967232 }
  0xd9   :  { %185 = vsyncpa [#allocation4], 1 }
  0xda   :  { %186 = vsyncpa [#allocation5], 1 }
  0xdb   :  { %187 = vsyncpa [#allocation6], 1 }

</bundles_post_ra>
